<compile_context>
chip_gen: v5e
topology: v5e:2x2
jax: 0.10.0
libtpu: 0.0.40
codegen_flags: <defaults>
</compile_context>

<pallas_src>
import functools

import jax
import jax.numpy as jnp
from jax.experimental import pallas as pl
from jax.experimental.pallas import tpu as pltpu


# --------------------------- tiling helpers -------------------------------- #

def _pick_tile(dim, target, align):
    """Largest multiple of `align` that divides `dim` and is <= `target`.
    Falls back to the full dimension (always a legal block size)."""
    best = None
    t = align
    while t <= min(dim, target):
        if dim % t == 0:
            best = t
        t += align
    return best if best is not None else dim


def _pick_group_block(num_groups, seq, dim_head, budget_bytes=12 << 20):
    """Number of (batch*head) groups per attention grid step.

    Budget: q/k/v/out blocks are pipelined (double-buffered) bf16; the SxS
    score/prob temporaries are kernel-internal f32 (single-buffered).
    Also capped so the grid keeps >= 2 steps: the "parallel" axis can then be
    sharded across v7x's 2 TensorCores (v5e/v6e unaffected).
    """
    per_group_io = 4 * seq * dim_head * 2          # q, k, v, out  (bf16)
    per_group_tmp = 2 * seq * seq * 4              # scores + probs (f32)
    step_cap = max(1, num_groups // 2)
    best = 1
    for g in range(1, num_groups + 1):
        if num_groups % g != 0 or g > step_cap:
            continue
        if 2 * g * per_group_io + g * per_group_tmp <= budget_bytes:
            best = g
    return best


# ----------------------------- kernels ------------------------------------ #

def _qkv_proj_kernel(x_ref, wq_ref, wk_ref, wv_ref, bq_ref, bk_ref, bv_ref,
                     qo_ref, ko_ref, vo_ref, qacc, kacc, vacc):
    """Q/K/V = x @ Wq/k/v + bq/k/v, K-axis tiled, f32 accumulation.
    x block is loaded once per step and feeds all three MXU contractions."""
    kstep = pl.program_id(2)

    @pl.when(kstep == 0)
    def _():
        qacc[...] = jnp.zeros_like(qacc)
        kacc[...] = jnp.zeros_like(kacc)
        vacc[...] = jnp.zeros_like(vacc)

    x = x_ref[...]
    qacc[...] += jnp.dot(x, wq_ref[...], preferred_element_type=jnp.float32)
    kacc[...] += jnp.dot(x, wk_ref[...], preferred_element_type=jnp.float32)
    vacc[...] += jnp.dot(x, wv_ref[...], preferred_element_type=jnp.float32)

    @pl.when(kstep == pl.num_programs(2) - 1)
    def _():
        qo_ref[...] = (qacc[...] + bq_ref[...]).astype(qo_ref.dtype)
        ko_ref[...] = (kacc[...] + bk_ref[...]).astype(ko_ref.dtype)
        vo_ref[...] = (vacc[...] + bv_ref[...]).astype(vo_ref.dtype)


def _attention_kernel(q_ref, k_ref, v_ref, o_ref):
    """softmax(Q K^T) V for a block of (batch*head) groups.
    The dim_head**-0.5 scale is pre-folded into wq/bq (no per-score multiply)."""
    q = q_ref[...]          # (Gblk, S, Dh) bf16
    k = k_ref[...]
    v = v_ref[...]
    s = jnp.einsum("gqd,gkd->gqk", q, k,
                   preferred_element_type=jnp.float32)
    s = s - jnp.max(s, axis=-1, keepdims=True)
    p = jnp.exp(s)                                             # f32
    inv = pl.reciprocal(jnp.sum(p, axis=-1, keepdims=True), approx=True)
    ctx = jnp.einsum("gqk,gkd->gqd", p.astype(q.dtype), v,
                     preferred_element_type=jnp.float32)
    o_ref[...] = (ctx * inv).astype(o_ref.dtype)


def _outproj_residual_ln_kernel(ctx_ref, w_ref, b_ref, x_ref, g_ref, beta_ref,
                                o_ref, acc_ref, *, eps):
    """out = LayerNorm(ctx @ Wo + bo + x); K-axis tiled, LN fused in epilogue."""
    kstep = pl.program_id(1)

    @pl.when(kstep == 0)
    def _():
        acc_ref[...] = jnp.zeros_like(acc_ref)

    acc_ref[...] += jnp.dot(ctx_ref[...], w_ref[...],
                            preferred_element_type=jnp.float32)

    @pl.when(kstep == pl.num_programs(1) - 1)
    def _():
        t = acc_ref[...] + b_ref[...] + x_ref[...]             # f32
        mu = jnp.mean(t, axis=-1, keepdims=True)
        var = jnp.mean((t - mu) ** 2, axis=-1, keepdims=True)
        norm = (t - mu) * jax.lax.rsqrt(var + eps)
        o_ref[...] = (norm * g_ref[...] + beta_ref[...]).astype(o_ref.dtype)


# ----------------------------- wrappers ------------------------------------ #

def fused_qkv_projection(x2d, wq, wk, wv, bq, bk, bv):
    """x2d: (N, D) bf16; wq/wk/wv: (D, D) bf16; bq/bk/bv: (1, D) f32.
    Returns three (N, D) bf16 arrays (Q already carries the softmax scale)."""
    N, D = x2d.shape
    tm = _pick_tile(N, 512, 16)     # larger M tile -> fewer weight re-streams
    tn = _pick_tile(D, 512, 128)
    tk = _pick_tile(D, 512, 128)
    grid = (N // tm, D // tn, D // tk)
    # Note: on v5e, pipeline_mode=pl.Buffered(3) on the weight specs can hide
    # the weight DMA further; kept at the default depth here.
    w_spec = pl.BlockSpec((tk, tn), lambda i, j, k: (k, j))
    b_spec = pl.BlockSpec((1, tn), lambda i, j, k: (0, j))
    o_spec = pl.BlockSpec((tm, tn), lambda i, j, k: (i, j))
    out_sds = jax.ShapeDtypeStruct((N, D), jnp.bfloat16)
    return pl.pallas_call(
        _qkv_proj_kernel,
        out_shape=(out_sds, out_sds, out_sds),
        grid=grid,
        in_specs=[
            pl.BlockSpec((tm, tk), lambda i, j, k: (i, k)),   # x
            w_spec, w_spec, w_spec,                           # wq, wk, wv
            b_spec, b_spec, b_spec,                           # bq, bk, bv
        ],
        out_specs=(o_spec, o_spec, o_spec),
        scratch_shapes=[pltpu.VMEM((tm, tn), jnp.float32)] * 3,
        compiler_params=pltpu.CompilerParams(
            dimension_semantics=("parallel", "parallel", "arbitrary")),
    )(x2d, wq, wk, wv, bq, bk, bv)


def scaled_dot_product_attention(q, k, v):
    """q/k/v: (G, S, Dh) bf16 -> (G, S, Dh) bf16; softmax(Q K^T) V per group."""
    G, S, Dh = q.shape
    gblk = _pick_group_block(G, S, Dh)
    assert G % gblk == 0
    # TODO(synk): for S beyond ~1K, tile the KV axis with an online-softmax
    # (flash-style) inner loop so the SxS score block never materializes.
    # TODO(synk): for Dh < 128 a lane-dense (gblk, S*Dh) out_spec would avoid
    # masked vst.msk stores; kept 3-D here because Mosaic reshape support for
    # tiny unaligned tiles is shape-dependent.
    spec = pl.BlockSpec((gblk, S, Dh), lambda g: (g, 0, 0))
    return pl.pallas_call(
        _attention_kernel,
        out_shape=jax.ShapeDtypeStruct((G, S, Dh), jnp.bfloat16),
        grid=(G // gblk,),
        in_specs=[spec, spec, spec],
        out_specs=spec,
        compiler_params=pltpu.CompilerParams(
            dimension_semantics=("parallel",)),
    )(q, k, v)


def outproj_residual_layernorm(ctx2d, wo, bo, x2d, gamma, beta, eps=1e-5):
    """LayerNorm(ctx2d @ wo + bo + x2d). ctx2d/wo bf16; output (N, D) f32."""
    N, D = x2d.shape
    # Full-D rows so LayerNorm fuses into the matmul epilogue.  Tiles sized to
    # stay under v7x's 32 MiB scoped-VMEM default with double-buffering
    # (the x / out / acc full-D rows dominate at large D).
    tm_target = 64 if D >= 4096 else 128
    tm = _pick_tile(N, tm_target, 16)
    tk = _pick_tile(D, 256, 128)
    grid = (N // tm, D // tk)
    kern = functools.partial(_outproj_residual_ln_kernel, eps=eps)
    # TODO(synk): for D >= ~8K split into an N-tiled out-proj matmul kernel +
    # a separate LayerNorm kernel instead of holding full-D rows in VMEM.
    return pl.pallas_call(
        kern,
        out_shape=jax.ShapeDtypeStruct((N, D), jnp.float32),
        grid=grid,
        in_specs=[
            pl.BlockSpec((tm, tk), lambda i, k: (i, k)),   # ctx   (bf16)
            pl.BlockSpec((tk, D), lambda i, k: (k, 0)),    # Wo    (bf16)
            pl.BlockSpec((1, D), lambda i, k: (0, 0)),     # bo    (f32)
            pl.BlockSpec((tm, D), lambda i, k: (i, 0)),    # x res (f32)
            pl.BlockSpec((1, D), lambda i, k: (0, 0)),     # gamma
            pl.BlockSpec((1, D), lambda i, k: (0, 0)),     # beta
        ],
        out_specs=pl.BlockSpec((tm, D), lambda i, k: (i, 0)),
        scratch_shapes=[pltpu.VMEM((tm, D), jnp.float32)],
        compiler_params=pltpu.CompilerParams(
            dimension_semantics=("parallel", "arbitrary")),
    )(ctx2d, wo, bo, x2d, gamma, beta)


# ------------------------- parameters & forward ---------------------------- #

def init_params(key, dim_model):
    """Deterministic parameter init (PyTorch Linear-style uniform bounds)."""
    bound = 1.0 / (dim_model ** 0.5)
    keys = jax.random.split(key, 8)

    def u(k, shape):
        return jax.random.uniform(k, shape, jnp.float32, -bound, bound)

    return {
        "wq": u(keys[0], (dim_model, dim_model)), "bq": u(keys[1], (dim_model,)),
        "wk": u(keys[2], (dim_model, dim_model)), "bk": u(keys[3], (dim_model,)),
        "wv": u(keys[4], (dim_model, dim_model)), "bv": u(keys[5], (dim_model,)),
        "wo": u(keys[6], (dim_model, dim_model)), "bo": u(keys[7], (dim_model,)),
        "gamma": jnp.ones((dim_model,), jnp.float32),
        "beta": jnp.zeros((dim_model,), jnp.float32),
    }


def prepare_params(params, num_head):
    """One-time weight prep OUTSIDE the jitted forward: bf16 MXU weights,
    softmax scale folded into the Q projection, biases pre-reshaped to (1, D)."""
    D = params["wq"].shape[0]
    assert D % num_head == 0
    scale = float(D // num_head) ** -0.5
    row = lambda v: v.reshape(1, D)
    return {
        "wq": (params["wq"] * scale).astype(jnp.bfloat16),
        "wk": params["wk"].astype(jnp.bfloat16),
        "wv": params["wv"].astype(jnp.bfloat16),
        "wo": params["wo"].astype(jnp.bfloat16),
        "bq": row(params["bq"] * scale),
        "bk": row(params["bk"]),
        "bv": row(params["bv"]),
        "bo": row(params["bo"]),
        "gamma": row(params["gamma"]),
        "beta": row(params["beta"]),
    }


@functools.partial(jax.jit, static_argnums=2)
def multi_head_attention(x, prepped, num_head):
    """x: (B, S, dim_model) float32 -> (B, S, dim_model) float32."""
    B, S, D = x.shape
    assert D % num_head == 0
    dim_head = D // num_head
    N = B * S

    x2d = x.reshape(N, D)
    x2d_bf = x2d.astype(jnp.bfloat16)

    # Fused Q/K/V projection: x read once, three outputs (no slicing copies).
    q, k, v = fused_qkv_projection(
        x2d_bf, prepped["wq"], prepped["wk"], prepped["wv"],
        prepped["bq"], prepped["bk"], prepped["bv"])

    # Exact torch .view(B*num_head, -1, dim_head) semantics (row-major reshape;
    # free — no data movement).
    qh = q.reshape(B * num_head, S, dim_head)
    kh = k.reshape(B * num_head, S, dim_head)
    vh = v.reshape(B * num_head, S, dim_head)

    ctx = scaled_dot_product_attention(qh, kh, vh)            # bf16
    ctx2d = ctx.reshape(N, D)   # torch .view(B, -1, dim_head*num_head)

    # dropout(p=0.0) == identity; out-proj + residual + LayerNorm fused.
    out = outproj_residual_layernorm(
        ctx2d, prepped["wo"], prepped["bo"], x2d,
        prepped["gamma"], prepped["beta"], eps=1e-5)
    return out.reshape(B, S, D)


# Pure-f32 JAX reference (module-faithful) for a correctness check.
def _reference(x, params, num_head):
    B, S, D = x.shape
    dim_head = D // num_head
    q = x @ params["wq"] + params["bq"]
    k = x @ params["wk"] + params["bk"]
    v = x @ params["wv"] + params["bv"]
    qh = q.reshape(B * num_head, S, dim_head)
    kh = k.reshape(B * num_head, S, dim_head)
    vh = v.reshape(B * num_head, S, dim_head)
    scale = float(dim_head) ** -0.5
    att = jnp.einsum("gqd,gkd->gqk", qh, kh) * scale
    att = jax.nn.softmax(att, axis=-1)
    ctx = jnp.einsum("gqk,gkd->gqd", att, vh).reshape(B, S, D)
    out = ctx @ params["wo"] + params["bo"]
    out = out + x
    mu = jnp.mean(out, axis=-1, keepdims=True)
    var = jnp.mean((out - mu) ** 2, axis=-1, keepdims=True)
    out = (out - mu) / jnp.sqrt(var + 1e-5)
    return out * params["gamma"] + params["beta"]


if __name__ == "__main__":
    batch, seq, dim_model, num_head = 2, 8, 32, 4

    key = jax.random.PRNGKey(0)
    kx, kp = jax.random.split(key)
    x = jax.random.normal(kx, (batch, seq, dim_model), jnp.float32)
    params = init_params(kp, dim_model)
    prepped = prepare_params(params, num_head)     # one-time, outside the jit

    out = multi_head_attention(x, prepped, num_head)
    out = jax.block_until_ready(out)

    ref = _reference(x, params, num_head)
    assert out.shape == (batch, seq, dim_model)
    # bf16 MXU operands (f32 accumulation) + approx reciprocal vs the pure-f32
    # reference: expected deviation is O(1e-3) on ~unit-variance LN outputs.
    err = float(jnp.max(jnp.abs(out - ref)))
    assert err < 3e-2, f"mismatch vs reference: max abs err = {err}"

    print("KERNEL_OK")
</pallas_src>

<mosaic_0001>
module attributes {stable_mosaic.version = 11 : i64} {
  func.func @_attention_kernel(%arg0: i32, %arg1: memref<4x8x8xbf16, #tpu.memory_space<vmem>>, %arg2: memref<4x8x8xbf16, #tpu.memory_space<vmem>>, %arg3: memref<4x8x8xbf16, #tpu.memory_space<vmem>>, %arg4: memref<4x8x8xbf16, #tpu.memory_space<vmem>>) attributes {dimension_semantics = [#tpu.dimension_semantics<parallel>], iteration_bounds = array<i64: 2>, scalar_prefetch = 0 : i64, scratch_operands = 0 : i64, tpu.core_type = #tpu.core_type<tc>, window_params = [{transform_indices = @transform_0, window_bounds = array<i64: 4, 8, 8>}, {transform_indices = @transform_1, window_bounds = array<i64: 4, 8, 8>}, {transform_indices = @transform_2, window_bounds = array<i64: 4, 8, 8>}, {transform_indices = @transform_3, window_bounds = array<i64: 4, 8, 8>}]} {
    %c0 = arith.constant 0 : index
    %c0_0 = arith.constant 0 : index
    %c0_1 = arith.constant 0 : index
    %0 = vector.load %arg1[%c0, %c0_0, %c0_1] : memref<4x8x8xbf16, #tpu.memory_space<vmem>>, vector<4x8x8xbf16>
    %c0_2 = arith.constant 0 : index
    %c0_3 = arith.constant 0 : index
    %c0_4 = arith.constant 0 : index
    %1 = vector.load %arg2[%c0_2, %c0_3, %c0_4] : memref<4x8x8xbf16, #tpu.memory_space<vmem>>, vector<4x8x8xbf16>
    %c0_5 = arith.constant 0 : index
    %c0_6 = arith.constant 0 : index
    %c0_7 = arith.constant 0 : index
    %2 = vector.load %arg3[%c0_5, %c0_6, %c0_7] : memref<4x8x8xbf16, #tpu.memory_space<vmem>>, vector<4x8x8xbf16>
    "tpu.trace_start"() <{level = 10 : i32, message = "gqd,gkd->gqk"}> : () -> ()
    %cst = arith.constant dense<0.000000e+00> : vector<4x8x8xf32>
    %3 = tpu.matmul %0, %1, %cst {dimension_numbers = #tpu.dot_dimension_numbers<[2], [2], [1], [1], [0, 0, 0, 1, 1, 1], [0], [0]>} : vector<4x8x8xbf16>, vector<4x8x8xbf16>, vector<4x8x8xf32> -> vector<4x8x8xf32>
    "tpu.trace_stop"() : () -> ()
    %cst_8 = arith.constant dense<0xFF800000> : vector<4x8xf32>
    %4 = vector.multi_reduction <maximumf>, %3, %cst_8 [2] : vector<4x8x8xf32> to vector<4x8xf32>
    %5 = vector.shape_cast %4 : vector<4x8xf32> to vector<4x8x1xf32>
    %6 = vector.broadcast %5 : vector<4x8x1xf32> to vector<4x8x8xf32>
    %7 = arith.subf %3, %6 : vector<4x8x8xf32>
    %8 = math.exp %7 : vector<4x8x8xf32>
    %cst_9 = arith.constant dense<0.000000e+00> : vector<4x8xf32>
    %9 = vector.multi_reduction <add>, %8, %cst_9 [2] : vector<4x8x8xf32> to vector<4x8xf32>
    %10 = vector.shape_cast %9 : vector<4x8xf32> to vector<4x8x1xf32>
    %11 = tpu.reciprocal %10 {approx = true} : vector<4x8x1xf32> -> vector<4x8x1xf32>
    %12 = arith.truncf %8 : vector<4x8x8xf32> to vector<4x8x8xbf16>
    "tpu.trace_start"() <{level = 10 : i32, message = "gqk,gkd->gqd"}> : () -> ()
    %cst_10 = arith.constant dense<0.000000e+00> : vector<4x8x8xf32>
    %13 = tpu.matmul %12, %2, %cst_10 {dimension_numbers = #tpu.dot_dimension_numbers<[2], [1], [1], [2], [0, 0, 0, 1, 1, 2], [0], [0]>} : vector<4x8x8xbf16>, vector<4x8x8xbf16>, vector<4x8x8xf32> -> vector<4x8x8xf32>
    "tpu.trace_stop"() : () -> ()
    %14 = vector.broadcast %11 : vector<4x8x1xf32> to vector<4x8x8xf32>
    %15 = arith.mulf %13, %14 : vector<4x8x8xf32>
    %16 = arith.truncf %15 : vector<4x8x8xf32> to vector<4x8x8xbf16>
    %c0_11 = arith.constant 0 : index
    %c0_12 = arith.constant 0 : index
    %c0_13 = arith.constant 0 : index
    %17 = vector.load %arg4[%c0_11, %c0_12, %c0_13] : memref<4x8x8xbf16, #tpu.memory_space<vmem>>, vector<4x8x8xbf16>
    tpu.vector_store %arg4[%c0_11, %c0_12, %c0_13], %16 {strides = array<i32>} : memref<4x8x8xbf16, #tpu.memory_space<vmem>>, vector<4x8x8xbf16>,
    return
  }
  func.func @transform_0(%arg0: i32) -> (i32, i32, i32) {
    %c0_i32 = arith.constant 0 : i32
    %c0_i32_0 = arith.constant 0 : i32
    %c0_i32_1 = arith.constant 0 : i32
    return %arg0, %c0_i32, %c0_i32_0 : i32, i32, i32
  }
  func.func @transform_1(%arg0: i32) -> (i32, i32, i32) {
    %c0_i32 = arith.constant 0 : i32
    %c0_i32_0 = arith.constant 0 : i32
    %c0_i32_1 = arith.constant 0 : i32
    return %arg0, %c0_i32, %c0_i32_0 : i32, i32, i32
  }
  func.func @transform_2(%arg0: i32) -> (i32, i32, i32) {
    %c0_i32 = arith.constant 0 : i32
    %c0_i32_0 = arith.constant 0 : i32
    %c0_i32_1 = arith.constant 0 : i32
    return %arg0, %c0_i32, %c0_i32_0 : i32, i32, i32
  }
  func.func @transform_3(%arg0: i32) -> (i32, i32, i32) {
    %c0_i32 = arith.constant 0 : i32
    %c0_i32_0 = arith.constant 0 : i32
    %c0_i32_1 = arith.constant 0 : i32
    return %arg0, %c0_i32, %c0_i32_0 : i32, i32, i32
  }
}

module attributes {stable_mosaic.version = 11 : i64} {
  func.func @_qkv_proj_kernel(%arg0: i32, %arg1: i32, %arg2: i32, %arg3: memref<16x32xbf16, #tpu.memory_space<vmem>>, %arg4: memref<32x32xbf16, #tpu.memory_space<vmem>>, %arg5: memref<32x32xbf16, #tpu.memory_space<vmem>>, %arg6: memref<32x32xbf16, #tpu.memory_space<vmem>>, %arg7: memref<1x32xf32, #tpu.memory_space<vmem>>, %arg8: memref<1x32xf32, #tpu.memory_space<vmem>>, %arg9: memref<1x32xf32, #tpu.memory_space<vmem>>, %arg10: memref<16x32xbf16, #tpu.memory_space<vmem>>, %arg11: memref<16x32xbf16, #tpu.memory_space<vmem>>, %arg12: memref<16x32xbf16, #tpu.memory_space<vmem>>, %arg13: memref<16x32xf32, #tpu.memory_space<vmem>>, %arg14: memref<16x32xf32, #tpu.memory_space<vmem>>, %arg15: memref<16x32xf32, #tpu.memory_space<vmem>>) attributes {dimension_semantics = [#tpu.dimension_semantics<parallel>, #tpu.dimension_semantics<parallel>, #tpu.dimension_semantics<arbitrary>], iteration_bounds = array<i64: 1, 1, 1>, scalar_prefetch = 0 : i64, scratch_operands = 3 : i64, tpu.core_type = #tpu.core_type<tc>, window_params = [{transform_indices = @transform_0, window_bounds = array<i64: 16, 32>}, {transform_indices = @transform_1, window_bounds = array<i64: 32, 32>}, {transform_indices = @transform_2, window_bounds = array<i64: 32, 32>}, {transform_indices = @transform_3, window_bounds = array<i64: 32, 32>}, {transform_indices = @transform_4, window_bounds = array<i64: 1, 32>}, {transform_indices = @transform_5, window_bounds = array<i64: 1, 32>}, {transform_indices = @transform_6, window_bounds = array<i64: 1, 32>}, {transform_indices = @transform_7, window_bounds = array<i64: 16, 32>}, {transform_indices = @transform_8, window_bounds = array<i64: 16, 32>}, {transform_indices = @transform_9, window_bounds = array<i64: 16, 32>}]} {
    %c0_i32 = arith.constant 0 : i32
    %0 = arith.cmpi eq, %arg2, %c0_i32 : i32
    %1 = arith.extui %0 : i1 to i32
    %c0_i32_0 = arith.constant 0 : i32
    %2 = arith.cmpi ne, %1, %c0_i32_0 : i32
    scf.if %2 {
      %cst_24 = arith.constant 0.000000e+00 : f32
      %22 = vector.broadcast %cst_24 : f32 to vector<16x32xf32>
      %c0_25 = arith.constant 0 : index
      %c0_26 = arith.constant 0 : index
      %23 = vector.load %arg13[%c0_25, %c0_26] : memref<16x32xf32, #tpu.memory_space<vmem>>, vector<16x32xf32>
      tpu.vector_store %arg13[%c0_25, %c0_26], %22 {strides = array<i32>} : memref<16x32xf32, #tpu.memory_space<vmem>>, vector<16x32xf32>,
      %cst_27 = arith.constant 0.000000e+00 : f32
      %24 = vector.broadcast %cst_27 : f32 to vector<16x32xf32>
      %c0_28 = arith.constant 0 : index
      %c0_29 = arith.constant 0 : index
      %25 = vector.load %arg14[%c0_28, %c0_29] : memref<16x32xf32, #tpu.memory_space<vmem>>, vector<16x32xf32>
      tpu.vector_store %arg14[%c0_28, %c0_29], %24 {strides = array<i32>} : memref<16x32xf32, #tpu.memory_space<vmem>>, vector<16x32xf32>,
      %cst_30 = arith.constant 0.000000e+00 : f32
      %26 = vector.broadcast %cst_30 : f32 to vector<16x32xf32>
      %c0_31 = arith.constant 0 : index
      %c0_32 = arith.constant 0 : index
      %27 = vector.load %arg15[%c0_31, %c0_32] : memref<16x32xf32, #tpu.memory_space<vmem>>, vector<16x32xf32>
      tpu.vector_store %arg15[%c0_31, %c0_32], %26 {strides = array<i32>} : memref<16x32xf32, #tpu.memory_space<vmem>>, vector<16x32xf32>,
    } else {
    }
    %c0 = arith.constant 0 : index
    %c0_1 = arith.constant 0 : index
    %3 = vector.load %arg3[%c0, %c0_1] : memref<16x32xbf16, #tpu.memory_space<vmem>>, vector<16x32xbf16>
    %c0_2 = arith.constant 0 : index
    %c0_3 = arith.constant 0 : index
    %4 = vector.load %arg13[%c0_2, %c0_3] : memref<16x32xf32, #tpu.memory_space<vmem>>, vector<16x32xf32>
    %c0_4 = arith.constant 0 : index
    %c0_5 = arith.constant 0 : index
    %5 = vector.load %arg4[%c0_4, %c0_5] : memref<32x32xbf16, #tpu.memory_space<vmem>>, vector<32x32xbf16>
    %cst = arith.constant dense<0.000000e+00> : vector<16x32xf32>
    %6 = tpu.matmul %3, %5, %cst {dimension_numbers = #tpu.dot_dimension_numbers<[1], [0], [0], [1], [0, 0, 1, 1], [], []>} : vector<16x32xbf16>, vector<32x32xbf16>, vector<16x32xf32> -> vector<16x32xf32>
    %7 = arith.addf %4, %6 : vector<16x32xf32>
    %c0_6 = arith.constant 0 : index
    %c0_7 = arith.constant 0 : index
    %8 = vector.load %arg13[%c0_6, %c0_7] : memref<16x32xf32, #tpu.memory_space<vmem>>, vector<16x32xf32>
    tpu.vector_store %arg13[%c0_6, %c0_7], %7 {strides = array<i32>} : memref<16x32xf32, #tpu.memory_space<vmem>>, vector<16x32xf32>,
    %c0_8 = arith.constant 0 : index
    %c0_9 = arith.constant 0 : index
    %9 = vector.load %arg14[%c0_8, %c0_9] : memref<16x32xf32, #tpu.memory_space<vmem>>, vector<16x32xf32>
    %c0_10 = arith.constant 0 : index
    %c0_11 = arith.constant 0 : index
    %10 = vector.load %arg5[%c0_10, %c0_11] : memref<32x32xbf16, #tpu.memory_space<vmem>>, vector<32x32xbf16>
    %cst_12 = arith.constant dense<0.000000e+00> : vector<16x32xf32>
    %11 = tpu.matmul %3, %10, %cst_12 {dimension_numbers = #tpu.dot_dimension_numbers<[1], [0], [0], [1], [0, 0, 1, 1], [], []>} : vector<16x32xbf16>, vector<32x32xbf16>, vector<16x32xf32> -> vector<16x32xf32>
    %12 = arith.addf %9, %11 : vector<16x32xf32>
    %c0_13 = arith.constant 0 : index
    %c0_14 = arith.constant 0 : index
    %13 = vector.load %arg14[%c0_13, %c0_14] : memref<16x32xf32, #tpu.memory_space<vmem>>, vector<16x32xf32>
    tpu.vector_store %arg14[%c0_13, %c0_14], %12 {strides = array<i32>} : memref<16x32xf32, #tpu.memory_space<vmem>>, vector<16x32xf32>,
    %c0_15 = arith.constant 0 : index
    %c0_16 = arith.constant 0 : index
    %14 = vector.load %arg15[%c0_15, %c0_16] : memref<16x32xf32, #tpu.memory_space<vmem>>, vector<16x32xf32>
    %c0_17 = arith.constant 0 : index
    %c0_18 = arith.constant 0 : index
    %15 = vector.load %arg6[%c0_17, %c0_18] : memref<32x32xbf16, #tpu.memory_space<vmem>>, vector<32x32xbf16>
    %cst_19 = arith.constant dense<0.000000e+00> : vector<16x32xf32>
    %16 = tpu.matmul %3, %15, %cst_19 {dimension_numbers = #tpu.dot_dimension_numbers<[1], [0], [0], [1], [0, 0, 1, 1], [], []>} : vector<16x32xbf16>, vector<32x32xbf16>, vector<16x32xf32> -> vector<16x32xf32>
    %17 = arith.addf %14, %16 : vector<16x32xf32>
    %c0_20 = arith.constant 0 : index
    %c0_21 = arith.constant 0 : index
    %18 = vector.load %arg15[%c0_20, %c0_21] : memref<16x32xf32, #tpu.memory_space<vmem>>, vector<16x32xf32>
    tpu.vector_store %arg15[%c0_20, %c0_21], %17 {strides = array<i32>} : memref<16x32xf32, #tpu.memory_space<vmem>>, vector<16x32xf32>,
    %c0_i32_22 = arith.constant 0 : i32
    %19 = arith.cmpi eq, %arg2, %c0_i32_22 : i32
    %20 = arith.extui %19 : i1 to i32
    %c0_i32_23 = arith.constant 0 : i32
    %21 = arith.cmpi ne, %20, %c0_i32_23 : i32
    scf.if %21 {
      %c0_24 = arith.constant 0 : index
      %c0_25 = arith.constant 0 : index
      %22 = vector.load %arg13[%c0_24, %c0_25] : memref<16x32xf32, #tpu.memory_space<vmem>>, vector<16x32xf32>
      %c0_26 = arith.constant 0 : index
      %c0_27 = arith.constant 0 : index
      %23 = vector.load %arg7[%c0_26, %c0_27] : memref<1x32xf32, #tpu.memory_space<vmem>>, vector<1x32xf32>
      %24 = vector.broadcast %23 : vector<1x32xf32> to vector<16x32xf32>
      %25 = arith.addf %22, %24 : vector<16x32xf32>
      %26 = arith.truncf %25 : vector<16x32xf32> to vector<16x32xbf16>
      %c0_28 = arith.constant 0 : index
      %c0_29 = arith.constant 0 : index
      %27 = vector.load %arg10[%c0_28, %c0_29] : memref<16x32xbf16, #tpu.memory_space<vmem>>, vector<16x32xbf16>
      tpu.vector_store %arg10[%c0_28, %c0_29], %26 {strides = array<i32>} : memref<16x32xbf16, #tpu.memory_space<vmem>>, vector<16x32xbf16>,
      %c0_30 = arith.constant 0 : index
      %c0_31 = arith.constant 0 : index
      %28 = vector.load %arg14[%c0_30, %c0_31] : memref<16x32xf32, #tpu.memory_space<vmem>>, vector<16x32xf32>
      %c0_32 = arith.constant 0 : index
      %c0_33 = arith.constant 0 : index
      %29 = vector.load %arg8[%c0_32, %c0_33] : memref<1x32xf32, #tpu.memory_space<vmem>>, vector<1x32xf32>
      %30 = vector.broadcast %29 : vector<1x32xf32> to vector<16x32xf32>
      %31 = arith.addf %28, %30 : vector<16x32xf32>
      %32 = arith.truncf %31 : vector<16x32xf32> to vector<16x32xbf16>
      %c0_34 = arith.constant 0 : index
      %c0_35 = arith.constant 0 : index
      %33 = vector.load %arg11[%c0_34, %c0_35] : memref<16x32xbf16, #tpu.memory_space<vmem>>, vector<16x32xbf16>
      tpu.vector_store %arg11[%c0_34, %c0_35], %32 {strides = array<i32>} : memref<16x32xbf16, #tpu.memory_space<vmem>>, vector<16x32xbf16>,
      %c0_36 = arith.constant 0 : index
      %c0_37 = arith.constant 0 : index
      %34 = vector.load %arg15[%c0_36, %c0_37] : memref<16x32xf32, #tpu.memory_space<vmem>>, vector<16x32xf32>
      %c0_38 = arith.constant 0 : index
      %c0_39 = arith.constant 0 : index
      %35 = vector.load %arg9[%c0_38, %c0_39] : memref<1x32xf32, #tpu.memory_space<vmem>>, vector<1x32xf32>
      %36 = vector.broadcast %35 : vector<1x32xf32> to vector<16x32xf32>
      %37 = arith.addf %34, %36 : vector<16x32xf32>
      %38 = arith.truncf %37 : vector<16x32xf32> to vector<16x32xbf16>
      %c0_40 = arith.constant 0 : index
      %c0_41 = arith.constant 0 : index
      %39 = vector.load %arg12[%c0_40, %c0_41] : memref<16x32xbf16, #tpu.memory_space<vmem>>, vector<16x32xbf16>
      tpu.vector_store %arg12[%c0_40, %c0_41], %38 {strides = array<i32>} : memref<16x32xbf16, #tpu.memory_space<vmem>>, vector<16x32xbf16>,
    } else {
    }
    return
  }
  func.func @transform_0(%arg0: i32, %arg1: i32, %arg2: i32) -> (i32, i32) {
    %c0_i32 = arith.constant 0 : i32
    return %arg0, %arg2 : i32, i32
  }
  func.func @transform_1(%arg0: i32, %arg1: i32, %arg2: i32) -> (i32, i32) {
    %c0_i32 = arith.constant 0 : i32
    return %arg2, %arg1 : i32, i32
  }
  func.func @transform_2(%arg0: i32, %arg1: i32, %arg2: i32) -> (i32, i32) {
    %c0_i32 = arith.constant 0 : i32
    return %arg2, %arg1 : i32, i32
  }
  func.func @transform_3(%arg0: i32, %arg1: i32, %arg2: i32) -> (i32, i32) {
    %c0_i32 = arith.constant 0 : i32
    return %arg2, %arg1 : i32, i32
  }
  func.func @transform_4(%arg0: i32, %arg1: i32, %arg2: i32) -> (i32, i32) {
    %c0_i32 = arith.constant 0 : i32
    %c0_i32_0 = arith.constant 0 : i32
    return %c0_i32, %arg1 : i32, i32
  }
  func.func @transform_5(%arg0: i32, %arg1: i32, %arg2: i32) -> (i32, i32) {
    %c0_i32 = arith.constant 0 : i32
    %c0_i32_0 = arith.constant 0 : i32
    return %c0_i32, %arg1 : i32, i32
  }
  func.func @transform_6(%arg0: i32, %arg1: i32, %arg2: i32) -> (i32, i32) {
    %c0_i32 = arith.constant 0 : i32
    %c0_i32_0 = arith.constant 0 : i32
    return %c0_i32, %arg1 : i32, i32
  }
  func.func @transform_7(%arg0: i32, %arg1: i32, %arg2: i32) -> (i32, i32) {
    %c0_i32 = arith.constant 0 : i32
    return %arg0, %arg1 : i32, i32
  }
  func.func @transform_8(%arg0: i32, %arg1: i32, %arg2: i32) -> (i32, i32) {
    %c0_i32 = arith.constant 0 : i32
    return %arg0, %arg1 : i32, i32
  }
  func.func @transform_9(%arg0: i32, %arg1: i32, %arg2: i32) -> (i32, i32) {
    %c0_i32 = arith.constant 0 : i32
    return %arg0, %arg1 : i32, i32
  }
}

module attributes {stable_mosaic.version = 11 : i64} {
  func.func @_outproj_residual_ln_kernel(%arg0: i32, %arg1: i32, %arg2: memref<16x32xbf16, #tpu.memory_space<vmem>>, %arg3: memref<32x32xbf16, #tpu.memory_space<vmem>>, %arg4: memref<1x32xf32, #tpu.memory_space<vmem>>, %arg5: memref<16x32xf32, #tpu.memory_space<vmem>>, %arg6: memref<1x32xf32, #tpu.memory_space<vmem>>, %arg7: memref<1x32xf32, #tpu.memory_space<vmem>>, %arg8: memref<16x32xf32, #tpu.memory_space<vmem>>, %arg9: memref<16x32xf32, #tpu.memory_space<vmem>>) attributes {dimension_semantics = [#tpu.dimension_semantics<parallel>, #tpu.dimension_semantics<arbitrary>], iteration_bounds = array<i64: 1, 1>, scalar_prefetch = 0 : i64, scratch_operands = 1 : i64, tpu.core_type = #tpu.core_type<tc>, window_params = [{transform_indices = @transform_0, window_bounds = array<i64: 16, 32>}, {transform_indices = @transform_1, window_bounds = array<i64: 32, 32>}, {pipeline_mode = #tpu.pipeline_mode<synchronous>, transform_indices = @transform_2, window_bounds = array<i64: 1, 32>}, {transform_indices = @transform_3, window_bounds = array<i64: 16, 32>}, {pipeline_mode = #tpu.pipeline_mode<synchronous>, transform_indices = @transform_4, window_bounds = array<i64: 1, 32>}, {pipeline_mode = #tpu.pipeline_mode<synchronous>, transform_indices = @transform_5, window_bounds = array<i64: 1, 32>}, {transform_indices = @transform_6, window_bounds = array<i64: 16, 32>}]} {
    %c0_i32 = arith.constant 0 : i32
    %0 = arith.cmpi eq, %arg1, %c0_i32 : i32
    %1 = arith.extui %0 : i1 to i32
    %c0_i32_0 = arith.constant 0 : i32
    %2 = arith.cmpi ne, %1, %c0_i32_0 : i32
    scf.if %2 {
      %cst_10 = arith.constant 0.000000e+00 : f32
      %12 = vector.broadcast %cst_10 : f32 to vector<16x32xf32>
      %c0_11 = arith.constant 0 : index
      %c0_12 = arith.constant 0 : index
      %13 = vector.load %arg9[%c0_11, %c0_12] : memref<16x32xf32, #tpu.memory_space<vmem>>, vector<16x32xf32>
      tpu.vector_store %arg9[%c0_11, %c0_12], %12 {strides = array<i32>} : memref<16x32xf32, #tpu.memory_space<vmem>>, vector<16x32xf32>,
    } else {
    }
    %c0 = arith.constant 0 : index
    %c0_1 = arith.constant 0 : index
    %3 = vector.load %arg9[%c0, %c0_1] : memref<16x32xf32, #tpu.memory_space<vmem>>, vector<16x32xf32>
    %c0_2 = arith.constant 0 : index
    %c0_3 = arith.constant 0 : index
    %4 = vector.load %arg2[%c0_2, %c0_3] : memref<16x32xbf16, #tpu.memory_space<vmem>>, vector<16x32xbf16>
    %c0_4 = arith.constant 0 : index
    %c0_5 = arith.constant 0 : index
    %5 = vector.load %arg3[%c0_4, %c0_5] : memref<32x32xbf16, #tpu.memory_space<vmem>>, vector<32x32xbf16>
    %cst = arith.constant dense<0.000000e+00> : vector<16x32xf32>
    %6 = tpu.matmul %4, %5, %cst {dimension_numbers = #tpu.dot_dimension_numbers<[1], [0], [0], [1], [0, 0, 1, 1], [], []>} : vector<16x32xbf16>, vector<32x32xbf16>, vector<16x32xf32> -> vector<16x32xf32>
    %7 = arith.addf %3, %6 : vector<16x32xf32>
    %c0_6 = arith.constant 0 : index
    %c0_7 = arith.constant 0 : index
    %8 = vector.load %arg9[%c0_6, %c0_7] : memref<16x32xf32, #tpu.memory_space<vmem>>, vector<16x32xf32>
    tpu.vector_store %arg9[%c0_6, %c0_7], %7 {strides = array<i32>} : memref<16x32xf32, #tpu.memory_space<vmem>>, vector<16x32xf32>,
    %c0_i32_8 = arith.constant 0 : i32
    %9 = arith.cmpi eq, %arg1, %c0_i32_8 : i32
    %10 = arith.extui %9 : i1 to i32
    %c0_i32_9 = arith.constant 0 : i32
    %11 = arith.cmpi ne, %10, %c0_i32_9 : i32
    scf.if %11 {
      %c0_10 = arith.constant 0 : index
      %c0_11 = arith.constant 0 : index
      %12 = vector.load %arg9[%c0_10, %c0_11] : memref<16x32xf32, #tpu.memory_space<vmem>>, vector<16x32xf32>
      %c0_12 = arith.constant 0 : index
      %c0_13 = arith.constant 0 : index
      %13 = vector.load %arg4[%c0_12, %c0_13] : memref<1x32xf32, #tpu.memory_space<vmem>>, vector<1x32xf32>
      %14 = vector.broadcast %13 : vector<1x32xf32> to vector<16x32xf32>
      %15 = arith.addf %12, %14 : vector<16x32xf32>
      %c0_14 = arith.constant 0 : index
      %c0_15 = arith.constant 0 : index
      %16 = vector.load %arg5[%c0_14, %c0_15] : memref<16x32xf32, #tpu.memory_space<vmem>>, vector<16x32xf32>
      %17 = arith.addf %15, %16 : vector<16x32xf32>
      %cst_16 = arith.constant dense<0.000000e+00> : vector<16xf32>
      %18 = vector.multi_reduction <add>, %17, %cst_16 [1] : vector<16x32xf32> to vector<16xf32>
      %19 = vector.shape_cast %18 : vector<16xf32> to vector<16x1xf32>
      %cst_17 = arith.constant 3.200000e+01 : f32
      %20 = vector.broadcast %cst_17 : f32 to vector<16x1xf32>
      %21 = arith.divf %19, %20 : vector<16x1xf32>
      %22 = vector.broadcast %21 : vector<16x1xf32> to vector<16x32xf32>
      %23 = arith.subf %17, %22 : vector<16x32xf32>
      %24 = arith.mulf %23, %23 : vector<16x32xf32>
      %cst_18 = arith.constant dense<0.000000e+00> : vector<16xf32>
      %25 = vector.multi_reduction <add>, %24, %cst_18 [1] : vector<16x32xf32> to vector<16xf32>
      %26 = vector.shape_cast %25 : vector<16xf32> to vector<16x1xf32>
      %cst_19 = arith.constant 3.200000e+01 : f32
      %27 = vector.broadcast %cst_19 : f32 to vector<16x1xf32>
      %28 = arith.divf %26, %27 : vector<16x1xf32>
      %29 = vector.broadcast %21 : vector<16x1xf32> to vector<16x32xf32>
      %30 = arith.subf %17, %29 : vector<16x32xf32>
      %cst_20 = arith.constant 9.99999974E-6 : f32
      %31 = vector.broadcast %cst_20 : f32 to vector<16x1xf32>
      %32 = arith.addf %28, %31 : vector<16x1xf32>
      %33 = math.rsqrt %32 : vector<16x1xf32>
      %34 = vector.broadcast %33 : vector<16x1xf32> to vector<16x32xf32>
      %35 = arith.mulf %30, %34 : vector<16x32xf32>
      %c0_21 = arith.constant 0 : index
      %c0_22 = arith.constant 0 : index
      %36 = vector.load %arg6[%c0_21, %c0_22] : memref<1x32xf32, #tpu.memory_space<vmem>>, vector<1x32xf32>
      %37 = vector.broadcast %36 : vector<1x32xf32> to vector<16x32xf32>
      %38 = arith.mulf %35, %37 : vector<16x32xf32>
      %c0_23 = arith.constant 0 : index
      %c0_24 = arith.constant 0 : index
      %39 = vector.load %arg7[%c0_23, %c0_24] : memref<1x32xf32, #tpu.memory_space<vmem>>, vector<1x32xf32>
      %40 = vector.broadcast %39 : vector<1x32xf32> to vector<16x32xf32>
      %41 = arith.addf %38, %40 : vector<16x32xf32>
      %c0_25 = arith.constant 0 : index
      %c0_26 = arith.constant 0 : index
      %42 = vector.load %arg8[%c0_25, %c0_26] : memref<16x32xf32, #tpu.memory_space<vmem>>, vector<16x32xf32>
      tpu.vector_store %arg8[%c0_25, %c0_26], %41 {strides = array<i32>} : memref<16x32xf32, #tpu.memory_space<vmem>>, vector<16x32xf32>,
    } else {
    }
    return
  }
  func.func @transform_0(%arg0: i32, %arg1: i32) -> (i32, i32) {
    %c0_i32 = arith.constant 0 : i32
    return %arg0, %arg1 : i32, i32
  }
  func.func @transform_1(%arg0: i32, %arg1: i32) -> (i32, i32) {
    %c0_i32 = arith.constant 0 : i32
    %c0_i32_0 = arith.constant 0 : i32
    return %arg1, %c0_i32 : i32, i32
  }
  func.func @transform_2(%arg0: i32, %arg1: i32) -> (i32, i32) {
    %c0_i32 = arith.constant 0 : i32
    %c0_i32_0 = arith.constant 0 : i32
    %c0_i32_1 = arith.constant 0 : i32
    return %c0_i32, %c0_i32_0 : i32, i32
  }
  func.func @transform_3(%arg0: i32, %arg1: i32) -> (i32, i32) {
    %c0_i32 = arith.constant 0 : i32
    %c0_i32_0 = arith.constant 0 : i32
    return %arg0, %c0_i32 : i32, i32
  }
  func.func @transform_4(%arg0: i32, %arg1: i32) -> (i32, i32) {
    %c0_i32 = arith.constant 0 : i32
    %c0_i32_0 = arith.constant 0 : i32
    %c0_i32_1 = arith.constant 0 : i32
    return %c0_i32, %c0_i32_0 : i32, i32
  }
  func.func @transform_5(%arg0: i32, %arg1: i32) -> (i32, i32) {
    %c0_i32 = arith.constant 0 : i32
    %c0_i32_0 = arith.constant 0 : i32
    %c0_i32_1 = arith.constant 0 : i32
    return %c0_i32, %c0_i32_0 : i32, i32
  }
  func.func @transform_6(%arg0: i32, %arg1: i32) -> (i32, i32) {
    %c0_i32 = arith.constant 0 : i32
    %c0_i32_0 = arith.constant 0 : i32
    return %arg0, %c0_i32 : i32, i32
  }
}

</mosaic_0001>

<bundles_post_ra>
// kernel: multi_head_attention.3
= control target key start
LH: loop header
LB: loop body
LE: loop exit
PB: predicated region body
PF: predicated region fallthrough
CT: control target
= control target key end

     0   :  { %15 = vsyncpa [#allocation6], 0  ;;  %s545_s0 = inlined_call_operand.vmem [shape: bf16[16,32], index: 0, kind: input, shape index: {}]   ;;  %s546_s1 = inlined_call_operand.vmem [shape: bf16[32,32], index: 1, kind: input, shape index: {}]   ;;  %s547_s2 = inlined_call_operand.hbm [shape: bf16[32,32], index: 2, kind: input, shape index: {}]   ;;  %s548_s3 = inlined_call_operand.vmem [shape: bf16[32,32], index: 3, kind: input, shape index: {}]   ;;  %s549_s4 = inlined_call_operand.hbm [shape: f32[1,32], index: 4, kind: input, shape index: {}]   ;;  %s550_s5 = inlined_call_operand.hbm [shape: f32[1,32], index: 5, kind: input, shape index: {}]   ;;  %s551_s6 = inlined_call_operand.hbm [shape: f32[1,32], index: 6, kind: input, shape index: {}]   ;;  %s552_s7 = inlined_call_operand.vmem [shape: bf16[16,32], index: 7, kind: output, shape index: {0}]   ;;  %s553_s8 = inlined_call_operand.vmem [shape: bf16[16,32], index: 8, kind: output, shape index: {1}]   ;;  %s554_s9 = inlined_call_operand.vmem [shape: bf16[16,32], index: 9, kind: output, shape index: {2}]  }
   0x1   :  { %16 = vsyncpa [#allocation8], 0  ;;  %s42_s11 = sshll.u32 %s549_s4, 4  ;;  %s43_s11 = int_to_ptr.hbm [resolvable:$true] %s42_s11 }
   0x2   :  { %17 = vsyncpa [#allocation11], 0  ;;  %s422_s12 = smov [#allocation7]   ;;  %s26_s16 = sshll.u32 %s547_s2, 4  ;;  %s27_s16 = int_to_ptr.hbm [resolvable:$true] %s26_s16 }
   0x3   :  { %s44_s13 = sshll.u32 %s422_s12, 4  ;;  %s423_s17 = smov [#allocation5]   ;;  %s45_s13 = int_to_ptr.vmem [resolvable:$true] %s44_s13 }
   0x4   :  { %47 = dma.hbm_to_vmem [thread:$0]  %s43_s11, 16, %s45_s13, [#allocation8]  }
   0x5   :  { %s28_s18 = sshll.u32 %s423_s17, 4  ;;  %s424_s19 = smov 64   ;;  %s29_s18 = int_to_ptr.vmem [resolvable:$true] %s28_s18 }
   0x6   :  { %s425_s20 = smov 4   ;;  %s53_s4 = sshll.u32 %s550_s5, 4  ;;  %s54_s4 = int_to_ptr.hbm [resolvable:$true] %s53_s4 }
   0x7   :  { %34 = dma.hbm_to_vmem [thread:$0]  %s27_s16, 256, %s29_s18, [#allocation6], %s424_s19, %s424_s19, %s425_s20  }
   0x8   :  { %s426_s23 = smov [#allocation9]   ;;  %s64_s2 = sshll.u32 %s551_s6, 4  ;;  %s65_s2 = int_to_ptr.hbm [resolvable:$true] %s64_s2 }
   0x9   :  { %s55_s24 = sshll.u32 %s426_s23, 4  ;;  %s427_s27 = smov [#allocation10]   ;;  %s56_s24 = int_to_ptr.vmem [resolvable:$true] %s55_s24 }
   0xa   :  { %58 = dma.hbm_to_vmem [thread:$0]  %s54_s4, 16, %s56_s24, [#allocation8]  }
   0xb   :  { %s66_s28 = sshll.u32 %s427_s27, 4  ;;  %s67_s28 = int_to_ptr.vmem [resolvable:$true] %s66_s28 }
   0xc   :  { %69 = dma.hbm_to_vmem [thread:$0]  %s65_s2, 16, %s67_s28, [#allocation11]  }
   0xd   :  { %416 = dma.done.wait [#allocation6], 256  }
   0xe   :  { %417 = vsyncadd [#allocation6], 4294967040 }
   0xf   :  { %418 = dma.done.wait [#allocation8], 32  }
  0x10   :  { %419 = vsyncadd [#allocation8], 4294967264 }
  0x11   :  { %420 = dma.done.wait [#allocation11], 16  }
  0x12   :  { %421 = vsyncadd [#allocation11], 4294967280  ;;  %vm91_vm0 = vcmask 261120   ;;  %v428_v0 = vmov 0.0   ;;  %v305_v1 = vld [vmem:[%s546_s1 + $0x8] sm:$0xff]  ;;  %v307_v2 = vld [vmem:[#allocation5 + $0x8] sm:$0xff] }
  0x13   :  { %92 = vst.msk [vmem:[#allocation2] sm:$0xff] %vm91_vm0, %v428_v0  ;;  %v309_v3 = vld [vmem:[%s548_s3 + $0x8] sm:$0xff]  ;;  %133 = vmatpush.bf16.msra.mxu0 %v305_v1  ;;  %169 = vmatpush.bf16.msra.mxu1 %v307_v2  ;;  %v304_v4 = vld [vmem:[%s546_s1] sm:$0xff]  ;;  %v306_v5 = vld [vmem:[#allocation5] sm:$0xff]  ;;  %vm230_vm1 = vcmask 257024  }
  0x14   :  { %93 = vst.msk [vmem:[#allocation2 + $0x8] sm:$0xff] %vm91_vm0, %v428_v0  ;;  %205 = vmatpush.bf16.msra.mxu2 %v309_v3  ;;  %v308_v6 = vld [vmem:[%s548_s3] sm:$0xff] }
  0x15   :  { %94 = vst.msk [vmem:[#allocation3] sm:$0xff] %vm91_vm0, %v428_v0  ;;  %v303_v7 = vld [vmem:[%s545_s0] sm:$0xff] }
  0x16   :  { %95 = vst.msk [vmem:[#allocation3 + $0x8] sm:$0xff] %vm91_vm0, %v428_v0  ;;  %v317_v17 = vld [vmem:[#allocation7] ss:$0 sm:$0xff]  ;;  %v318_v19 = vld [vmem:[#allocation9] ss:$0 sm:$0xff] }
  0x17   :  { %96 = vst.msk [vmem:[#allocation4] sm:$0xff] %vm91_vm0, %v428_v0  ;;  %134 = vmatpush.bf16.msra.mxu0 %v304_v4  ;;  %170 = vmatpush.bf16.msra.mxu1 %v306_v5  ;;  %v319_v32 = vld [vmem:[#allocation10] ss:$0 sm:$0xff] }
  0x18   :  { %97 = vst.msk [vmem:[#allocation4 + $0x8] sm:$0xff] %vm91_vm0, %v428_v0  ;;  %206 = vmatpush.bf16.msra.mxu2 %v308_v6 }
  0x1a   :  { %284 = vmatmul.msk.bf16.vlgmr.msra.gmra.mxu0 %vm91_vm0, %v303_v7  ;;  %293 = vmatmul.msk.bf16.vlgmr.msra.gmra.mxu1 %vm91_vm0, %v303_v7  ;;  %v100_v8 = vld [vmem:[#allocation2] sm:$0xff] }
  0x1b   :  { %302 = vmatmul.msk.bf16.vlgmr.msra.gmra.mxu2 %vm91_vm0, %v303_v7  ;;  %v101_v15 = vld [vmem:[#allocation2 + $0x8] sm:$0xff] }
  0x1c   :  { %v145_v9 = vld [vmem:[#allocation3] sm:$0xff] }
  0x1d   :  { %v146_v16 = vld [vmem:[#allocation3 + $0x8] sm:$0xff] }
  0x1e   :  { %v181_v14 = vld [vmem:[#allocation4] sm:$0xff] }
  0x1f   :  { %v182_v30 = vld [vmem:[#allocation4 + $0x8] sm:$0xff] }
  0x97   :  { %v136_v10 = vpop.f32.mrf.mxu0  ;;  %v172_v11 = vpop.f32.mrf.mxu1 }
  0x98   :  { %v141_v12 = vadd.f32 %v136_v10, %v100_v8  ;;  %v177_v13 = vadd.f32 %v172_v11, %v145_v9 }
  0x9a   :  { %143 = vst.msk [vmem:[#allocation2] sm:$0xff] %vm91_vm0, %v141_v12 }
  0x9b   :  { %179 = vst.msk [vmem:[#allocation3] sm:$0xff] %vm91_vm0, %v177_v13 }
  0x9e   :  { %v208_v18 = vpop.f32.mrf.mxu2 }
  0x9f   :  { %v213_v20 = vadd.f32 %v208_v18, %v181_v14  ;;  %v138_v21 = vpop.f32.mrf.mxu0  ;;  %v174_v22 = vpop.f32.mrf.mxu1 }
  0xa0   :  { %v142_v23 = vadd.f32 %v138_v21, %v101_v15  ;;  %v178_v24 = vadd.f32 %v174_v22, %v146_v16 }
  0xa1   :  { %v220_v25 = vld [vmem:[#allocation2] sm:$0xff]  ;;  %215 = vst.msk [vmem:[#allocation4] sm:$0xff] %vm91_vm0, %v213_v20 }
  0xa2   :  { %v226_v26 = vadd.f32 %v317_v17, %v220_v25  ;;  %v233_v27 = vld [vmem:[#allocation3] sm:$0xff]  ;;  %144 = vst.msk [vmem:[#allocation2 + $0x8] sm:$0xff] %vm91_vm0, %v142_v23 }
  0xa3   :  { %v239_v28 = vadd.f32 %v318_v19, %v233_v27  ;;  %180 = vst.msk [vmem:[#allocation3 + $0x8] sm:$0xff] %vm91_vm0, %v178_v24 }
  0xa4   :  { %v228_v29 = vpack.c.bf16 %v226_v26, %v226_v26 }
  0xa5   :  { %v241_v31 = vpack.c.bf16 %v239_v28, %v239_v28 }
  0xa6   :  { %231 = vst.msk [vmem:[%s552_s7] sm:$0xf] %vm230_vm1, %v228_v29  ;;  %v210_v33 = vpop.f32.mrf.mxu2 }
  0xa7   :  { %243 = vst.msk [vmem:[%s553_s8] sm:$0xf] %vm230_vm1, %v241_v31  ;;  %v214_v34 = vadd.f32 %v210_v33, %v182_v30 }
  0xa8   :  { %v245_v35 = vld [vmem:[#allocation4] sm:$0xff] }
  0xa9   :  { %v251_v36 = vadd.f32 %v319_v32, %v245_v35  ;;  %v221_v37 = vld [vmem:[#allocation2 + $0x8] sm:$0xff]  ;;  %216 = vst.msk [vmem:[#allocation4 + $0x8] sm:$0xff] %vm91_vm0, %v214_v34 }
  0xaa   :  { %v227_v38 = vadd.f32 %v317_v17, %v221_v37  ;;  %v234_v39 = vld [vmem:[#allocation3 + $0x8] sm:$0xff] }
  0xab   :  { %v253_v40 = vpack.c.bf16 %v251_v36, %v251_v36  ;;  %v240_v41 = vadd.f32 %v318_v19, %v234_v39 }
  0xac   :  { %v229_v42 = vpack.c.bf16 %v227_v38, %v227_v38 }
  0xad   :  { %255 = vst.msk [vmem:[%s554_s9] sm:$0xf] %vm230_vm1, %v253_v40  ;;  %v242_v43 = vpack.c.bf16 %v240_v41, %v240_v41 }
  0xae   :  { %232 = vst.msk [vmem:[%s552_s7 + $0x4] sm:$0xf] %vm230_vm1, %v229_v42 }
  0xaf   :  { %244 = vst.msk [vmem:[%s553_s8 + $0x4] sm:$0xf] %vm230_vm1, %v242_v43 }
  0xb0   :  { %v246_v44 = vld [vmem:[#allocation4 + $0x8] sm:$0xff] }
  0xb1   :  { %v252_v45 = vadd.f32 %v319_v32, %v246_v44 }
  0xb3   :  { %v254_v46 = vpack.c.bf16 %v252_v45, %v252_v45 }
  0xb5   :  { %256 = vst.msk [vmem:[%s554_s9 + $0x4] sm:$0xf] %vm230_vm1, %v254_v46 }
  0xb6   :  { %269 = vsyncpa [#allocation6], 1 }
  0xb7   :  { %270 = vsyncpa [#allocation8], 1 }
  0xb8   :  { %271 = vsyncpa [#allocation11], 1 }

// kernel: multi_head_attention.4
= control target key start
LH: loop header
LB: loop body
LE: loop exit
PB: predicated region body
PF: predicated region fallthrough
CT: control target
= control target key end

     0   :  { %s597_s12 = smov 0   ;;  %s650_s0 = inlined_call_operand.vmem [shape: bf16[8,8,8], index: 0, kind: input, shape index: {}]   ;;  %s651_s1 = inlined_call_operand.vmem [shape: bf16[8,8,8], index: 1, kind: input, shape index: {}]   ;;  %s652_s2 = inlined_call_operand.vmem [shape: bf16[8,8,8], index: 2, kind: input, shape index: {}]   ;;  %s653_s3 = inlined_call_operand.vmem [shape: bf16[8,8,8], index: 3, kind: output, shape index: {}]  }
   0x1 LB: > { %s522_s13 = sadd.s32 4294967295, %s575_s12   ;;  %p526_p0 = scmp.ge.s32.totalorder %s575_s12, 1  ;;  %s575_s12 = sphi %s597_s12, %s13_s12  }
   0x2   : > { %p160_p1 = scmp.lt.s32.totalorder %s575_s12, 3 }
   0x4   : > { %p161_p2 = pnand %p526_p0, %p160_p1 }
   0x5   : > { %s527_s14 = sshll.u32 (!%p161_p2), %s522_s13, 2 }
   0x6   : > { %164 = sbr.rel (%p161_p2) target bundleno = 433 (0x1b1), region = 32  ;;  %p195_p3 = scmp.lt.s32.totalorder (!%p161_p2), %s527_s14, 7 }
   0xb   : > { %s655_s14 = smov (!%p195_p3, %s527_s14), 7  ;;  %vm231_vm0 = vcmask 64512   ;;  %vm355_vm1 = vcmask 1043456   ;;  %vm437_vm2 = vcmask 60416  }
   0xc   : > { %s605_s15 = sshll.u32 %s655_s14, 2 }
   0xd   : > { %s204_s18 = scalar_lea.vmem %s651_s1, %s605_s15  ;;  %s198_s21 = scalar_lea.vmem %s650_s0, %s605_s15 }
   0xe   : > { %v223_v0 = vld [vmem:[%s204_s18] sm:$0xf]  ;;  %v225_v1 = vld [vmem:[%s204_s18 + $0x8] sm:$0xf]  ;;  %v226_v2 = vld [vmem:[%s204_s18 + $0xc] sm:$0xf]  ;;  %s210_s24 = scalar_lea.vmem %s652_s2, %s605_s15  ;;  %s216_s27 = scalar_lea.vmem %s653_s3, %s605_s15 }
   0xf   : > { %v236_v3 = vsel %vm231_vm0, %v223_v0, 0  ;;  %v274_v4 = vsel %vm231_vm0, %v225_v1, 0  ;;  %v293_v5 = vsel %vm231_vm0, %v226_v2, 0  ;;  %v224_v6 = vld [vmem:[%s204_s18 + $0x4] sm:$0xf] }
  0x10   : > { %245 = vmatpush.bf16.xpose.msra.mxu0 %v236_v3  ;;  %283 = vmatpush.bf16.xpose.msra.mxu2 %v274_v4  ;;  %v255_v7 = vsel %vm231_vm0, %v224_v6, 0  ;;  %v219_v8 = vld [vmem:[%s198_s21] sm:$0xf]  ;;  %v221_v9 = vld [vmem:[%s198_s21 + $0x8] sm:$0xf] }
  0x11   : > { %302 = vmatpush.bf16.xpose.msra.mxu3 %v293_v5  ;;  %264 = vmatpush.bf16.xpose.msra.mxu1 %v255_v7  ;;  %v222_v10 = vld [vmem:[%s198_s21 + $0xc] sm:$0xf]  ;;  %v220_v11 = vld [vmem:[%s198_s21 + $0x4] sm:$0xf]  ;;  %v227_v24 = vld [vmem:[%s210_s24] sm:$0xf] }
  0x12   : > { %v357_v25 = vsel %vm355_vm1, %v227_v24, 0  ;;  %v229_v26 = vld [vmem:[%s210_s24 + $0x8] sm:$0xf]  ;;  %v230_v27 = vld [vmem:[%s210_s24 + $0xc] sm:$0xf] }
  0x13   : > { %v395_v28 = vsel %vm355_vm1, %v229_v26, 0  ;;  %v414_v29 = vsel %vm355_vm1, %v230_v27, 0  ;;  %v228_v30 = vld [vmem:[%s210_s24 + $0x4] sm:$0xf] }
  0x14   : > { %v376_v31 = vsel %vm355_vm1, %v228_v30, 0 }
  0x17   : > { %535 = vmatmul.msk.bf16.vlgmr.msra.gmra.mxu0 %vm231_vm0, %v219_v8  ;;  %537 = vmatmul.msk.bf16.vlgmr.msra.gmra.mxu2 %vm231_vm0, %v221_v9 }
  0x18   : > { %538 = vmatmul.msk.bf16.vlgmr.msra.gmra.mxu3 %vm231_vm0, %v222_v10  ;;  %536 = vmatmul.msk.bf16.vlgmr.msra.gmra.mxu1 %vm231_vm0, %v220_v11 }
  0x19   : > { %366 = vmatpush.bf16.msrb.mxu0 %v357_v25  ;;  %404 = vmatpush.bf16.msrb.mxu2 %v395_v28 }
  0x1a   : > { %423 = vmatpush.bf16.msrb.mxu3 %v414_v29  ;;  %385 = vmatpush.bf16.msrb.mxu1 %v376_v31 }
  0x94   : > { %v247_v12 = vpop.f32.mrf.mxu0 }
  0x95   : > { %v308_v13 = vsel %vm231_vm0, %v247_v12, -inf  ;;  %v266_v14 = vpop.f32.mrf.mxu1 }
  0x96   : > { %309 = vmax.xlane.f32.xlu1 %v308_v13  ;;  %v311_v18 = vsel %vm231_vm0, %v266_v14, -inf }
  0x9a   : > { %v285_v15 = vpop.f32.mrf.mxu2 }
  0x9b   : > { %v304_v16 = vpop.f32.mrf.mxu3  ;;  %v314_v17 = vsel %vm231_vm0, %v285_v15, -inf }
  0x9c   : > { %315 = vmax.xlane.f32.xlu0 %v314_v17  ;;  %v249_v19 = vpop.f32.mrf.mxu0  ;;  %v317_v21 = vsel %vm231_vm0, %v304_v16, -inf }
  0x9d   : > { %v268_v20 = vpop.f32.mrf.mxu1 }
  0x9e   : > { %312 = vmax.xlane.f32.xlu1 %v311_v18 }
  0xa2   : > { %v287_v22 = vpop.f32.mrf.mxu2 }
  0xa3   : > { %v306_v23 = vpop.f32.mrf.mxu3 }
  0xa4   : > { %318 = vmax.xlane.f32.xlu0 %v317_v21 }
 0x109   : > { %v310_v32 = vpop.xlane.xlu1 %309 }
 0x10a   : > { %v320_v33 = vsub.f32 %v247_v12, %v310_v32 }
 0x10c   : > { %v324_v34 = vmul.f32 1.442695, %v320_v33 }
 0x10e   : > { %553 = vpow2.f32 %v324_v34 }
 0x10f   : > { %v316_v35 = vpop.xlane.xlu0 %315 }
 0x110   : > { %v322_v36 = vsub.f32 %v285_v15, %v316_v35 }
 0x111   : > { %v313_v37 = vpop.xlane.xlu1 %312 }
 0x112   : > { %v328_v38 = vmul.f32 1.442695, %v322_v36  ;;  %v321_v39 = vsub.f32 %v266_v14, %v313_v37 }
 0x114   : > { %v554_v40 = vpop.eup %553  ;;  %555 = vpow2.f32 %v328_v38  ;;  %v326_v41 = vmul.f32 1.442695, %v321_v39 }
 0x115   : > { %v332_v42 = vsel %vm231_vm0, %v554_v40, 0.0  ;;  %v348_v43 = vpack.c.bf16 %v554_v40, %v554_v40 }
 0x116   : > { %557 = vpow2.f32 %v326_v41  ;;  %333 = vadd.xlane.f32.xlu2 %v332_v42 }
 0x117   : > { %v319_v44 = vpop.xlane.xlu0 %318  ;;  %539 = vmatmul.msk.bf16.vlgmr.msrb.gmra.mxu0 %vm231_vm0, %v348_v43 }
 0x118   : > { %v323_v45 = vsub.f32 %v304_v16, %v319_v44 }
 0x11a   : > { %v556_v46 = vpop.eup %555  ;;  %v330_v47 = vmul.f32 1.442695, %v323_v45 }
 0x11b   : > { %v338_v48 = vsel %vm231_vm0, %v556_v46, 0.0  ;;  %v350_v49 = vpack.c.bf16 %v556_v46, %v556_v46 }
 0x11c   : > { %v558_v50 = vpop.eup %557  ;;  %559 = vpow2.f32 %v330_v47  ;;  %339 = vadd.xlane.f32.xlu0 %v338_v48 }
 0x11d   : > { %541 = vmatmul.msk.bf16.vlgmr.msrb.gmra.mxu2 %vm231_vm0, %v350_v49  ;;  %v335_v51 = vsel %vm231_vm0, %v558_v50, 0.0  ;;  %v349_v52 = vpack.c.bf16 %v558_v50, %v558_v50 }
 0x11e   : > { %336 = vadd.xlane.f32.xlu2 %v335_v51 }
 0x11f   : > { %540 = vmatmul.msk.bf16.vlgmr.msrb.gmra.mxu1 %vm231_vm0, %v349_v52 }
 0x122   : > { %v560_v53 = vpop.eup %559 }
 0x123   : > { %v341_v54 = vsel %vm231_vm0, %v560_v53, 0.0  ;;  %v351_v55 = vpack.c.bf16 %v560_v53, %v560_v53 }
 0x124   : > { %342 = vadd.xlane.f32.xlu1 %v341_v54 }
 0x125   : > { %542 = vmatmul.msk.bf16.vlgmr.msrb.gmra.mxu3 %vm231_vm0, %v351_v55 }
 0x189   : > { %v334_v56 = vpop.xlane.xlu2 %333 }
 0x18a   : > { %561 = vrcp.f32 %v334_v56 }
 0x18f   : > { %v340_v61 = vpop.xlane.xlu0 %339 }
 0x190   : > { %v562_v58 = vpop.eup %561 }
 0x191   : > { %v337_v57 = vpop.xlane.xlu2 %336 }
 0x192   : > { %563 = vrcp.f32 %v337_v57 }
 0x193   : > { %565 = vrcp.f32 %v340_v61 }
 0x194   : > { %v368_v59 = vpop.f32.mrf.mxu0 }
 0x195   : > { %v429_v60 = vmul.f32 %v562_v58, %v368_v59 }
 0x197   : > { %v433_v62 = vpack.c.bf16 %v429_v60, %v429_v60  ;;  %v343_v3 = vpop.xlane.xlu1 %342 }
 0x198   : > { %v564_v63 = vpop.eup %563  ;;  %567 = vrcp.f32 %v343_v3 }
 0x199   : > { %438 = vst.msk [vmem:[%s216_s27] sm:$0xf] %vm437_vm2, %v433_v62  ;;  %v566_v5 = vpop.eup %565 }
 0x19c   : > { %v370_v0 = vpop.f32.mrf.mxu0  ;;  %v387_v1 = vpop.f32.mrf.mxu1 }
 0x19d   : > { %v430_v2 = vmul.f32 %v564_v63, %v387_v1 }
 0x19e   : > { %v568_v10 = vpop.eup %567 }
 0x19f   : > { %v434_v4 = vpack.c.bf16 %v430_v2, %v430_v2 }
 0x1a0   : > { %v406_v6 = vpop.f32.mrf.mxu2 }
 0x1a1   : > { %439 = vst.msk [vmem:[%s216_s27 + $0x4] sm:$0xf] %vm437_vm2, %v434_v4  ;;  %v431_v7 = vmul.f32 %v566_v5, %v406_v6 }
 0x1a3   : > { %v435_v8 = vpack.c.bf16 %v431_v7, %v431_v7 }
 0x1a4   : > { %v389_v9 = vpop.f32.mrf.mxu1 }
 0x1a5   : > { %440 = vst.msk [vmem:[%s216_s27 + $0x8] sm:$0xf] %vm437_vm2, %v435_v8 }
 0x1a8   : > { %v408_v11 = vpop.f32.mrf.mxu2  ;;  %v425_v12 = vpop.f32.mrf.mxu3 }
 0x1a9   : > { %v432_v13 = vmul.f32 %v568_v10, %v425_v12 }
 0x1ab   : > { %v436_v14 = vpack.c.bf16 %v432_v13, %v432_v13 }
 0x1ad   : > { %441 = vst.msk [vmem:[%s216_s27 + $0xc] sm:$0xf] %vm437_vm2, %v436_v14 }
 0x1b0   : > { %v427_v15 = vpop.f32.mrf.mxu3 }
 0x1b1 PF: > { %s13_s12 = sadd.s32 1, %s575_s12  }
 0x1b2   : > { %p10_p4 = scmp.ge.s32.totalorder %s13_s12, 4  }
 0x1b4   :  { %12 = sbr.rel (!%p10_p4) target bundleno = 1 (0x1), region = 68 }

// kernel: multi_head_attention.5
= control target key start
LH: loop header
LB: loop body
LE: loop exit
PB: predicated region body
PF: predicated region fallthrough
CT: control target
= control target key end

     0   :  { %vm29_vm0 = vcmask 261120   ;;  %v233_v1 = vmov 0.0   ;;  %s311_s0 = inlined_call_operand.vmem [shape: bf16[16,32], index: 0, kind: input, shape index: {}]   ;;  %s312_s1 = inlined_call_operand.vmem [shape: bf16[32,32], index: 1, kind: input, shape index: {}]   ;;  %s313_s2 = inlined_call_operand.vmem [shape: f32[1,32], index: 2, kind: input, shape index: {}]   ;;  %s314_s3 = inlined_call_operand.vmem [shape: f32[16,32], index: 3, kind: input, shape index: {}]   ;;  %s315_s4 = inlined_call_operand.vmem [shape: f32[1,32], index: 4, kind: input, shape index: {}]   ;;  %s316_s5 = inlined_call_operand.vmem [shape: f32[1,32], index: 5, kind: input, shape index: {}]   ;;  %s317_s6 = inlined_call_operand.hbm [shape: f32[16,32], index: 6, kind: output, shape index: {}]  }
   0x1   :  { %v192_v0 = vld [vmem:[%s312_s1 + $0x8] sm:$0xff]  ;;  %30 = vst.msk [vmem:[#allocation2] sm:$0xff] %vm29_vm0, %v233_v1  ;;  %v191_v2 = vld [vmem:[%s312_s1] sm:$0xff] }
   0x2   :  { %67 = vmatpush.bf16.msra.mxu0 %v192_v0  ;;  %31 = vst.msk [vmem:[#allocation2 + $0x8] sm:$0xff] %vm29_vm0, %v233_v1 }
   0x3   :  { %11 = vsyncpa [#allocation4], 0  ;;  %v190_v3 = vld [vmem:[%s311_s0] sm:$0xff]  ;;  %v91_v17 = vld [vmem:[%s314_s3 + $0x8] sm:$0xff]  ;;  %v234_v21 = vmov 32.0   ;;  %s165_s12 = sshll.u32 %s317_s6, 4  ;;  %s166_s12 = int_to_ptr.hbm [resolvable:$true] %s165_s12 }
   0x4   :  { %v198_v8 = vld [vmem:[%s313_s2] ss:$0 sm:$0xff]  ;;  %201 = vrcp.f32 %v234_v21  ;;  %s237_s13 = smov 8  }
   0x5   :  { %v90_v12 = vld [vmem:[%s314_s3] sm:$0xff] }
   0x6   :  { %68 = vmatpush.bf16.msra.mxu0 %v191_v2  ;;  %v199_v52 = vld [vmem:[%s315_s4] ss:$0 sm:$0xff]  ;;  %s235_s4 = smov [#allocation3]  }
   0x7   :  { %v200_v56 = vld [vmem:[%s316_s5] ss:$0 sm:$0xff]  ;;  %s163_s9 = sshll.u32 %s235_s4, 4  ;;  %s236_s5 = smov 128   ;;  %s164_s9 = int_to_ptr.vmem [resolvable:$true] %s163_s9 }
   0x8   :  { %v32_v4 = vld [vmem:[#allocation2] sm:$0xff] }
   0x9   :  { %189 = vmatmul.msk.bf16.vlgmr.msra.gmra.mxu0 %vm29_vm0, %v190_v3  ;;  %v33_v7 = vld [vmem:[#allocation2 + $0x8] sm:$0xff] }
   0xa   :  { %v202_v22 = vpop.eup %201 }
   0xb   :  { %v101_v23 = vmul.f32 32.0, %v202_v22  ;;  %vm105_vm1 = vweird.f32 %v202_v22 }
   0xd   :  { %v102_v24 = vsub.f32 1.0, %v101_v23 }
   0xf   :  { %v103_v25 = vmul.f32 %v202_v22, %v102_v24 }
  0x11   :  { %v104_v26 = vadd.f32 %v202_v22, %v103_v25 }
  0x13   :  { %v106_v27 = vsel %vm105_vm1, %v202_v22, %v104_v26 }
  0x86   :  { %v70_v5 = vpop.f32.mrf.mxu0 }
  0x87   :  { %v75_v6 = vadd.f32 %v70_v5, %v32_v4 }
  0x89   :  { %77 = vst.msk [vmem:[#allocation2] sm:$0xff] %vm29_vm0, %v75_v6 }
  0x8e   :  { %v72_v9 = vpop.f32.mrf.mxu0 }
  0x8f   :  { %v76_v10 = vadd.f32 %v72_v9, %v33_v7 }
  0x90   :  { %v82_v11 = vld [vmem:[#allocation2] sm:$0xff] }
  0x91   :  { %78 = vst.msk [vmem:[#allocation2 + $0x8] sm:$0xff] %vm29_vm0, %v76_v10  ;;  %v88_v13 = vadd.f32 %v198_v8, %v82_v11 }
  0x93   :  { %v92_v14 = vadd.f32 %v90_v12, %v88_v13 }
  0x95   :  { %v94_v15 = vsel %vm29_vm0, %v92_v14, 0.0 }
  0x96   :  { %95 = vadd.xlane.f32.xlu0 %v94_v15 }
  0x98   :  { %v83_v16 = vld [vmem:[#allocation2 + $0x8] sm:$0xff] }
  0x99   :  { %v89_v18 = vadd.f32 %v198_v8, %v83_v16 }
  0x9b   :  { %v93_v19 = vadd.f32 %v91_v17, %v89_v18 }
  0x9d   :  { %v97_v20 = vsel %vm29_vm0, %v93_v19, 0.0 }
  0x9e   :  { %98 = vadd.xlane.f32.xlu0 %v97_v20 }
 0x109   :  { %v96_v28 = vpop.xlane.xlu0 %95 }
 0x10a   :  { %v107_v29 = vmul.f32 %v106_v27, %v96_v28 }
 0x10c   :  { %v109_v30 = vsub.f32 %v92_v14, %v107_v29 }
 0x10e   :  { %v111_v31 = vmul.f32 %v109_v30, %v109_v30 }
 0x110   :  { %v113_v32 = vsel %vm29_vm0, %v111_v31, 0.0 }
 0x111   :  { %114 = vadd.xlane.f32.xlu1 %v113_v32  ;;  %v99_v33 = vpop.xlane.xlu0 %98 }
 0x112   :  { %v108_v34 = vmul.f32 %v106_v27, %v99_v33 }
 0x114   :  { %v110_v35 = vsub.f32 %v93_v19, %v108_v34 }
 0x116   :  { %v112_v36 = vmul.f32 %v110_v35, %v110_v35 }
 0x118   :  { %v116_v37 = vsel %vm29_vm0, %v112_v36, 0.0 }
 0x119   :  { %117 = vadd.xlane.f32.xlu1 %v116_v37 }
 0x184   :  { %v115_v38 = vpop.xlane.xlu1 %114 }
 0x185   :  { %v119_v39 = vmul.f32 %v115_v38, %v106_v27 }
 0x187   :  { %v121_v40 = vadd.f32 1e-05, %v119_v39 }
 0x189   :  { %203 = vrsqrt.f32 %v121_v40  ;;  %vm129_vm3 = vweird.f32 %v121_v40 }
 0x18c   :  { %v118_v41 = vpop.xlane.xlu1 %117 }
 0x18d   :  { %v120_v42 = vmul.f32 %v118_v41, %v106_v27 }
 0x18f   :  { %v204_v43 = vpop.eup %203  ;;  %v122_v44 = vadd.f32 1e-05, %v120_v42 }
 0x190   :  { %v124_v45 = vmul.f32 %v204_v43, %v121_v40  ;;  %vm130_vm2 = vweird.f32 %v204_v43 }
 0x191   :  { %205 = vrsqrt.f32 %v122_v44  ;;  %vm131_vm4 = vmor %vm129_vm3, %vm130_vm2  ;;  %vm139_vm6 = vweird.f32 %v122_v44 }
 0x192   :  { %v125_v46 = vmul.f32 %v204_v43, %v124_v45 }
 0x194   :  { %v126_v47 = vmul.f32 0.5, %v125_v46 }
 0x196   :  { %v127_v48 = vsub.f32 1.5, %v126_v47 }
 0x197   :  { %v206_v49 = vpop.eup %205 }
 0x198   :  { %v128_v50 = vmul.f32 %v204_v43, %v127_v48  ;;  %v134_v51 = vmul.f32 %v206_v49, %v122_v44  ;;  %vm140_vm5 = vweird.f32 %v206_v49 }
 0x199   :  { %vm141_vm7 = vmor %vm139_vm6, %vm140_vm5 }
 0x19a   :  { %v132_v53 = vsel %vm131_vm4, %v204_v43, %v128_v50  ;;  %v135_v54 = vmul.f32 %v206_v49, %v134_v51 }
 0x19b   :  { %v143_v55 = vmul.f32 %v132_v53, %v109_v30 }
 0x19c   :  { %v136_v57 = vmul.f32 0.5, %v135_v54 }
 0x19d   :  { %v149_v58 = vmul.f32 %v199_v52, %v143_v55 }
 0x19e   :  { %v137_v59 = vsub.f32 1.5, %v136_v57 }
 0x19f   :  { %v155_v60 = vadd.f32 %v200_v56, %v149_v58 }
 0x1a0   :  { %v138_v61 = vmul.f32 %v206_v49, %v137_v59 }
 0x1a1   :  { %157 = vst.msk [vmem:[#allocation3] sm:$0xff] %vm29_vm0, %v155_v60 }
 0x1a2   :  { %v142_v62 = vsel %vm141_vm7, %v206_v49, %v138_v61 }
 0x1a3   :  { %v144_v63 = vmul.f32 %v142_v62, %v110_v35 }
 0x1a5   :  { %v150_v0 = vmul.f32 %v199_v52, %v144_v63 }
 0x1a7   :  { %v156_v1 = vadd.f32 %v200_v56, %v150_v0 }
 0x1a9   :  { %158 = vst.msk [vmem:[#allocation3 + $0x8] sm:$0xff] %vm29_vm0, %v156_v1 }
 0x1aa   :  { %171 = dma.vmem_to_hbm [thread:$0]  %s164_s9, 256, %s166_s12, [#allocation4], %s236_s5, %s236_s5, %s237_s13  }
 0x1ab   :  { %231 = dma.done.wait [#allocation4], 256  }
 0x1ac   :  { %232 = vsyncadd [#allocation4], 4294967040 }
 0x1ad   :  { %176 = vsyncpa [#allocation4], 1 }

</bundles_post_ra>
